<compile_context>
chip_gen: v7x
topology: tpu7x:2x2x1
jax: 0.10.0
libtpu: 0.0.40
codegen_flags: <defaults>
</compile_context>

<pallas_src>
import functools

import jax
import jax.numpy as jnp
from jax.experimental import pallas as pl
from jax.experimental.pallas import tpu as pltpu


def _sigmoid(x):
    # Exact sigmoid. Only applied to tiny tensors now ((2C,1) channel gates
    # and (2,TN) spatial gates), so the divide cost is negligible and we stay
    # well within reference tolerance.
    return 1.0 / (1.0 + jnp.exp(-x))


# ---------------------------------------------------------------------------
# Path A: fully fused kernel, one grid step per batch element.
# Blocks are (1, C, N): channels in sublanes, spatial positions in lanes.
# ---------------------------------------------------------------------------
def _fused_kernel(x1_ref, x2_ref,
                  w1a_ref, w1b_ref, w1c_ref, w1d_ref, b1_ref, w2_ref, b2_ref,
                  wc1a_ref, wc1b_ref, bc1_ref, wc2_ref, bc2_ref,
                  out1_ref, out2_ref, *, a, b, inv_n):
    x1 = x1_ref[0]                                 # (C, N)
    x2 = x2_ref[0]
    x1f = x1.astype(jnp.float32)
    x2f = x2.astype(jnp.float32)
    C = x1.shape[0]

    # ---- ChannelCorrection: pools are lane (XLU) reductions ---------------
    avg1 = jnp.sum(x1f, axis=1, keepdims=True) * inv_n      # (C, 1)
    avg2 = jnp.sum(x2f, axis=1, keepdims=True) * inv_n
    mx1 = jnp.max(x1f, axis=1, keepdims=True)
    mx2 = jnp.max(x2f, axis=1, keepdims=True)

    h = (jnp.dot(w1a_ref[...], avg1, preferred_element_type=jnp.float32)
         + jnp.dot(w1b_ref[...], avg2, preferred_element_type=jnp.float32)
         + jnp.dot(w1c_ref[...], mx1, preferred_element_type=jnp.float32)
         + jnp.dot(w1d_ref[...], mx2, preferred_element_type=jnp.float32)
         + b1_ref[...])
    h = jnp.maximum(h, 0.0)                                  # (R, 1)
    # Merged Linear2 (R -> 2C); `a` folded into the gate.
    cw = a * _sigmoid(jnp.dot(w2_ref[...], h, preferred_element_type=jnp.float32)
                      + b2_ref[...])                         # (2C, 1)
    cw0 = cw[:C]                                             # a * channel_c[0]
    cw1 = cw[C:]                                             # a * channel_c[1]

    # ---- SpatialCorrection: 1x1 convs = matmuls contracting over C --------
    hs = jnp.maximum(
        jnp.dot(wc1a_ref[...], x1, preferred_element_type=jnp.float32)
        + jnp.dot(wc1b_ref[...], x2, preferred_element_type=jnp.float32)
        + bc1_ref[...], 0.0)                                 # (RS, N)
    # Merged conv2 (RS -> 2); `b` folded into the gate.
    sw = b * _sigmoid(jnp.dot(wc2_ref[...], hs, preferred_element_type=jnp.float32)
                      + bc2_ref[...])                        # (2, N)
    sw0 = sw[0:1, :]                                         # b * spatial_c[0]
    sw1 = sw[1:2, :]                                         # b * spatial_c[1]

    # ---- Factored residual mixing ------------------------------------------
    out1_ref[0] = (x1f + (cw1 + sw1) * x2f).astype(out1_ref.dtype)
    out2_ref[0] = (x2f + (cw0 + sw0) * x1f).astype(out2_ref.dtype)


# ---------------------------------------------------------------------------
# Path B, pass 1: channel gates. Grid (B, N_tiles); stats accumulated in
# VMEM scratch over the "arbitrary" N-tile axis, gates emitted at the last
# tile. Partial last tiles are masked so the mean/max stay exact.
# ---------------------------------------------------------------------------
def _channel_gate_kernel(x1_ref, x2_ref,
                         w1a_ref, w1b_ref, w1c_ref, w1d_ref, b1_ref,
                         w2_ref, b2_ref,
                         cw_ref,
                         sum1_ref, sum2_ref, max1_ref, max2_ref,
                         *, a, n_total, tile_n):
    t = pl.program_id(1)
    x1 = x1_ref[0].astype(jnp.float32)             # (C, TN)
    x2 = x2_ref[0].astype(jnp.float32)

    lane = jax.lax.broadcasted_iota(jnp.int32, x1.shape, 1)
    valid = (t * tile_n + lane) < n_total          # mask padded lanes

    @pl.when(t == 0)
    def _():
        sum1_ref[...] = jnp.zeros_like(sum1_ref)
        sum2_ref[...] = jnp.zeros_like(sum2_ref)
        max1_ref[...] = jnp.full(max1_ref.shape, -jnp.inf, max1_ref.dtype)
        max2_ref[...] = jnp.full(max2_ref.shape, -jnp.inf, max2_ref.dtype)

    sum1_ref[...] += jnp.sum(jnp.where(valid, x1, 0.0), axis=1, keepdims=True)
    sum2_ref[...] += jnp.sum(jnp.where(valid, x2, 0.0), axis=1, keepdims=True)
    max1_ref[...] = jnp.maximum(
        max1_ref[...], jnp.max(jnp.where(valid, x1, -jnp.inf), axis=1, keepdims=True))
    max2_ref[...] = jnp.maximum(
        max2_ref[...], jnp.max(jnp.where(valid, x2, -jnp.inf), axis=1, keepdims=True))

    @pl.when(t == pl.num_programs(1) - 1)
    def _():
        inv_n = 1.0 / float(n_total)
        avg1 = sum1_ref[...] * inv_n
        avg2 = sum2_ref[...] * inv_n
        h = (jnp.dot(w1a_ref[...], avg1, preferred_element_type=jnp.float32)
             + jnp.dot(w1b_ref[...], avg2, preferred_element_type=jnp.float32)
             + jnp.dot(w1c_ref[...], max1_ref[...], preferred_element_type=jnp.float32)
             + jnp.dot(w1d_ref[...], max2_ref[...], preferred_element_type=jnp.float32)
             + b1_ref[...])
        h = jnp.maximum(h, 0.0)
        cw = a * _sigmoid(jnp.dot(w2_ref[...], h, preferred_element_type=jnp.float32)
                          + b2_ref[...])           # (2C, 1), `a` folded in
        cw_ref[0] = cw.astype(cw_ref.dtype)


# ---------------------------------------------------------------------------
# Path B, pass 2: spatial gates + residual mixing, fully parallel over
# (B, N_tiles).  Takes the pre-scaled channel gates as a tiny constant input.
# ---------------------------------------------------------------------------
def _spatial_mix_kernel(x1_ref, x2_ref, cw_ref,
                        wc1a_ref, wc1b_ref, bc1_ref, wc2_ref, bc2_ref,
                        out1_ref, out2_ref, *, b):
    x1 = x1_ref[0]                                 # (C, TN)
    x2 = x2_ref[0]
    x1f = x1.astype(jnp.float32)
    x2f = x2.astype(jnp.float32)
    C = x1.shape[0]

    hs = jnp.maximum(
        jnp.dot(wc1a_ref[...], x1, preferred_element_type=jnp.float32)
        + jnp.dot(wc1b_ref[...], x2, preferred_element_type=jnp.float32)
        + bc1_ref[...], 0.0)                       # (RS, TN)
    sw = b * _sigmoid(jnp.dot(wc2_ref[...], hs, preferred_element_type=jnp.float32)
                      + bc2_ref[...])              # (2, TN)

    cw = cw_ref[0].astype(jnp.float32)             # (2C, 1), already scaled by a
    cw0 = cw[:C]
    cw1 = cw[C:]

    out1_ref[0] = (x1f + (cw1 + sw[1:2, :]) * x2f).astype(out1_ref.dtype)
    out2_ref[0] = (x2f + (cw0 + sw[0:1, :]) * x1f).astype(out2_ref.dtype)


# ---------------------------------------------------------------------------
# Wrapper: accepts NCHW tensors (like the PyTorch module). The (B, C, N)
# kernel layout is a free reshape of NCHW, so there are no transposes.
# ---------------------------------------------------------------------------
def co_correction(x1, x2, params, *, a=0.5, b=0.5, max_tile_n=None,
                  vmem_budget_bytes=12 * 1024 * 1024):
    B, C, H, W = x1.shape
    N = H * W
    x1r = x1.reshape(B, C, N)
    x2r = x2.reshape(B, C, N)

    R = params["w1a"].shape[0]        # dim*4 // reduction
    RS = params["wc1a"].shape[0]      # dim // reduction
    itemsize = jnp.dtype(x1.dtype).itemsize

    # VMEM budget: x1/x2/out1/out2 blocks double-buffered + f32 temporaries
    # + weights (counted double-buffered; they are small relative to budget).
    w_keys = ("w1a", "w1b", "w1c", "w1d", "b1", "w2", "b2",
              "wc1a", "wc1b", "bc1", "wc2", "bc2")
    w_bytes = 2 * sum(int(params[k].size) * params[k].dtype.itemsize for k in w_keys)
    per_n = 8 * C * itemsize + 4 * (RS + 6 * C)

    tile_n = N
    if w_bytes + per_n * N > vmem_budget_bytes:
        tile_n = (vmem_budget_bytes - w_bytes) // per_n
        tile_n = max(128, (int(tile_n) // 128) * 128)
    if max_tile_n is not None and max_tile_n < tile_n:
        tile_n = max(128, (int(max_tile_n) // 128) * 128)

    vmem_limit = 32 * 1024 * 1024

    def const1(shape):   # grid rank 1 constants (weights / biases)
        return pl.BlockSpec(shape, lambda bb: (0,) * len(shape))

    def const2(shape):   # grid rank 2 constants
        return pl.BlockSpec(shape, lambda bb, tt: (0,) * len(shape))

    if tile_n >= N:
        # ---------------- fused single pass (x1/x2 read once) --------------
        kernel = functools.partial(_fused_kernel, a=float(a), b=float(b),
                                   inv_n=1.0 / float(N))
        out1r, out2r = pl.pallas_call(
            kernel,
            out_shape=(jax.ShapeDtypeStruct((B, C, N), x1.dtype),
                       jax.ShapeDtypeStruct((B, C, N), x2.dtype)),
            grid=(B,),
            in_specs=[
                pl.BlockSpec((1, C, N), lambda bb: (bb, 0, 0)),   # x1
                pl.BlockSpec((1, C, N), lambda bb: (bb, 0, 0)),   # x2
                const1((R, C)), const1((R, C)), const1((R, C)), const1((R, C)),
                const1((R, 1)),
                const1((2 * C, R)), const1((2 * C, 1)),
                const1((RS, C)), const1((RS, C)), const1((RS, 1)),
                const1((2, RS)), const1((2, 1)),
            ],
            out_specs=(pl.BlockSpec((1, C, N), lambda bb: (bb, 0, 0)),
                       pl.BlockSpec((1, C, N), lambda bb: (bb, 0, 0))),
            compiler_params=pltpu.CompilerParams(
                dimension_semantics=("parallel",),
                vmem_limit_bytes=vmem_limit),
        )(x1r, x2r,
          params["w1a"], params["w1b"], params["w1c"], params["w1d"], params["b1"],
          params["w2"], params["b2"],
          params["wc1a"], params["wc1b"], params["bc1"],
          params["wc2"], params["bc2"])
    else:
        # ---------------- two-pass N-tiled path (large H*W / small VMEM) ---
        nt = pl.cdiv(N, tile_n)

        gate_kernel = functools.partial(_channel_gate_kernel, a=float(a),
                                        n_total=N, tile_n=tile_n)
        cw = pl.pallas_call(
            gate_kernel,
            out_shape=jax.ShapeDtypeStruct((B, 2 * C, 1), jnp.float32),
            grid=(B, nt),
            in_specs=[
                pl.BlockSpec((1, C, tile_n), lambda bb, tt: (bb, 0, tt)),
                pl.BlockSpec((1, C, tile_n), lambda bb, tt: (bb, 0, tt)),
                const2((R, C)), const2((R, C)), const2((R, C)), const2((R, C)),
                const2((R, 1)),
                const2((2 * C, R)), const2((2 * C, 1)),
            ],
            out_specs=pl.BlockSpec((1, 2 * C, 1), lambda bb, tt: (bb, 0, 0)),
            scratch_shapes=[pltpu.VMEM((C, 1), jnp.float32)] * 4,
            compiler_params=pltpu.CompilerParams(
                dimension_semantics=("parallel", "arbitrary"),
                vmem_limit_bytes=vmem_limit),
        )(x1r, x2r,
          params["w1a"], params["w1b"], params["w1c"], params["w1d"], params["b1"],
          params["w2"], params["b2"])

        mix_kernel = functools.partial(_spatial_mix_kernel, b=float(b))
        out1r, out2r = pl.pallas_call(
            mix_kernel,
            out_shape=(jax.ShapeDtypeStruct((B, C, N), x1.dtype),
                       jax.ShapeDtypeStruct((B, C, N), x2.dtype)),
            grid=(B, nt),
            in_specs=[
                pl.BlockSpec((1, C, tile_n), lambda bb, tt: (bb, 0, tt)),
                pl.BlockSpec((1, C, tile_n), lambda bb, tt: (bb, 0, tt)),
                pl.BlockSpec((1, 2 * C, 1), lambda bb, tt: (bb, 0, 0)),
                const2((RS, C)), const2((RS, C)), const2((RS, 1)),
                const2((2, RS)), const2((2, 1)),
            ],
            out_specs=(pl.BlockSpec((1, C, tile_n), lambda bb, tt: (bb, 0, tt)),
                       pl.BlockSpec((1, C, tile_n), lambda bb, tt: (bb, 0, tt))),
            compiler_params=pltpu.CompilerParams(
                dimension_semantics=("parallel", "parallel"),
                vmem_limit_bytes=vmem_limit),
        )(x1r, x2r, cw,
          params["wc1a"], params["wc1b"], params["bc1"],
          params["wc2"], params["bc2"])

    return out1r.reshape(B, C, H, W), out2r.reshape(B, C, H, W)


# ---------------------------------------------------------------------------
# Pure-JAX reference (mirrors the PyTorch forward exactly).
# ---------------------------------------------------------------------------
def co_correction_ref(x1, x2, p, *, a=0.5, b=0.5):
    B, C, H, W = x1.shape
    x1f = x1.reshape(B, C, H * W)
    x2f = x2.reshape(B, C, H * W)

    # ChannelCorrection: cat order is [avg(x1) | avg(x2) | max(x1) | max(x2)].
    y = jnp.concatenate([x1f.mean(-1), x2f.mean(-1),
                         x1f.max(-1), x2f.max(-1)], axis=1)           # (B, 4C)
    W1 = jnp.concatenate([p["w1a"], p["w1b"], p["w1c"], p["w1d"]], axis=1)
    h = jnp.maximum(y @ W1.T + p["b1"][:, 0], 0.0)                    # (B, R)
    cw = jax.nn.sigmoid(h @ p["w2"].T + p["b2"][:, 0])                # (B, 2C)
    cw0 = cw[:, :C, None, None]
    cw1 = cw[:, C:, None, None]

    # SpatialCorrection: 1x1 convs on cat(x1, x2).
    Wc1 = jnp.concatenate([p["wc1a"], p["wc1b"]], axis=1)             # (RS, 2C)
    xcat = jnp.concatenate([x1, x2], axis=1)                          # (B, 2C, H, W)
    hs = jnp.maximum(jnp.einsum("oc,bchw->bohw", Wc1, xcat)
                     + p["bc1"][:, 0][None, :, None, None], 0.0)
    s = jax.nn.sigmoid(jnp.einsum("or,brhw->bohw", p["wc2"], hs)
                       + p["bc2"][:, 0][None, :, None, None])         # (B, 2, H, W)
    sw0 = s[:, 0:1]
    sw1 = s[:, 1:2]

    out1 = x1 + a * cw1 * x2 + b * sw1 * x2
    out2 = x2 + a * cw0 * x1 + b * sw0 * x1
    return out1, out2


# ---------------------------------------------------------------------------
# Deterministic parameters. Weights stored (out, in) for the (C, N) layout,
# pre-split along the torch concat boundaries so the kernels never
# concatenate or lane-slice.
# ---------------------------------------------------------------------------
def make_params(key, *, dim, reduction=1):
    C = dim
    R = dim * 4 // reduction
    RS = dim // reduction
    ks = jax.random.split(key, 10)
    std = 0.05
    return {
        # ChannelCorrection Linear(4C -> R), split by input quarter.
        "w1a": std * jax.random.normal(ks[0], (R, C), jnp.float32),
        "w1b": std * jax.random.normal(ks[1], (R, C), jnp.float32),
        "w1c": std * jax.random.normal(ks[2], (R, C), jnp.float32),
        "w1d": std * jax.random.normal(ks[3], (R, C), jnp.float32),
        "b1":  std * jax.random.normal(ks[4], (R, 1), jnp.float32),
        # Linear(R -> 2C): rows [:C] -> channel_c[0], rows [C:] -> channel_c[1].
        "w2":  std * jax.random.normal(ks[5], (2 * C, R), jnp.float32),
        "b2":  std * jax.random.normal(ks[6], (2 * C, 1), jnp.float32),
        # SpatialCorrection Conv2d(2C -> RS, 1x1), split by input half.
        "wc1a": std * jax.random.normal(ks[7], (RS, C), jnp.float32),
        "wc1b": std * jax.random.normal(ks[8], (RS, C), jnp.float32),
        "bc1":  std * jax.random.normal(ks[9], (RS, 1), jnp.float32),
        # Conv2d(RS -> 2, 1x1): row 0 -> spatial_c[0], row 1 -> spatial_c[1].
        "wc2": std * jax.random.normal(jax.random.fold_in(key, 100), (2, RS), jnp.float32),
        "bc2": std * jax.random.normal(jax.random.fold_in(key, 101), (2, 1), jnp.float32),
    }


if __name__ == "__main__":
    key = jax.random.PRNGKey(0)
    B, dim, H, W = 2, 8, 16, 16
    a_coef, b_coef = 0.5, 0.5

    pkey, k1, k2 = jax.random.split(key, 3)
    params = make_params(pkey, dim=dim, reduction=1)
    x1 = jax.random.normal(k1, (B, dim, H, W), jnp.float32)
    x2 = jax.random.normal(k2, (B, dim, H, W), jnp.float32)

    ref1, ref2 = co_correction_ref(x1, x2, params, a=a_coef, b=b_coef)

    # Fused single-pass path (whole spatial extent fits in VMEM).
    out1, out2 = co_correction(x1, x2, params, a=a_coef, b=b_coef)
    jax.block_until_ready((out1, out2))
    assert out1.shape == x1.shape and out2.shape == x2.shape
    assert jnp.allclose(out1, ref1, rtol=1e-3, atol=1e-3)
    assert jnp.allclose(out2, ref2, rtol=1e-3, atol=1e-3)

    # Force the N-tiled two-pass path (what large H*W / tight-VMEM chips use).
    t1, t2 = co_correction(x1, x2, params, a=a_coef, b=b_coef, max_tile_n=128)
    jax.block_until_ready((t1, t2))
    assert jnp.allclose(t1, ref1, rtol=1e-3, atol=1e-3)
    assert jnp.allclose(t2, ref2, rtol=1e-3, atol=1e-3)

    # bf16 activations (v6e/v7x recommendation): stats + matmul accum stay f32.
    x1b = x1.astype(jnp.bfloat16)
    x2b = x2.astype(jnp.bfloat16)
    o1b, o2b = co_correction(x1b, x2b, params, a=a_coef, b=b_coef)
    jax.block_until_ready((o1b, o2b))
    assert o1b.dtype == jnp.bfloat16 and o2b.dtype == jnp.bfloat16
    assert jnp.allclose(o1b.astype(jnp.float32), ref1, rtol=0.1, atol=0.1)
    assert jnp.allclose(o2b.astype(jnp.float32), ref2, rtol=0.1, atol=0.1)

    print("KERNEL_OK")
</pallas_src>

<mosaic_0001>
module attributes {stable_mosaic.version = 11 : i64} {
  func.func @_fused_kernel(%arg0: i32, %arg1: memref<1x8x256xf32, #tpu.memory_space<vmem>>, %arg2: memref<1x8x256xf32, #tpu.memory_space<vmem>>, %arg3: memref<32x8xf32, #tpu.memory_space<vmem>>, %arg4: memref<32x8xf32, #tpu.memory_space<vmem>>, %arg5: memref<32x8xf32, #tpu.memory_space<vmem>>, %arg6: memref<32x8xf32, #tpu.memory_space<vmem>>, %arg7: memref<32x1xf32, #tpu.memory_space<vmem>>, %arg8: memref<16x32xf32, #tpu.memory_space<vmem>>, %arg9: memref<16x1xf32, #tpu.memory_space<vmem>>, %arg10: memref<8x8xf32, #tpu.memory_space<vmem>>, %arg11: memref<8x8xf32, #tpu.memory_space<vmem>>, %arg12: memref<8x1xf32, #tpu.memory_space<vmem>>, %arg13: memref<2x8xf32, #tpu.memory_space<vmem>>, %arg14: memref<2x1xf32, #tpu.memory_space<vmem>>, %arg15: memref<1x8x256xf32, #tpu.memory_space<vmem>>, %arg16: memref<1x8x256xf32, #tpu.memory_space<vmem>>) attributes {dimension_semantics = [#tpu.dimension_semantics<parallel>], iteration_bounds = array<i64: 2>, scalar_prefetch = 0 : i64, scratch_operands = 0 : i64, tpu.core_type = #tpu.core_type<tc>, window_params = [{transform_indices = @transform_0, window_bounds = array<i64: 1, 8, 256>}, {transform_indices = @transform_1, window_bounds = array<i64: 1, 8, 256>}, {pipeline_mode = #tpu.pipeline_mode<synchronous>, transform_indices = @transform_2, window_bounds = array<i64: 32, 8>}, {pipeline_mode = #tpu.pipeline_mode<synchronous>, transform_indices = @transform_3, window_bounds = array<i64: 32, 8>}, {pipeline_mode = #tpu.pipeline_mode<synchronous>, transform_indices = @transform_4, window_bounds = array<i64: 32, 8>}, {pipeline_mode = #tpu.pipeline_mode<synchronous>, transform_indices = @transform_5, window_bounds = array<i64: 32, 8>}, {pipeline_mode = #tpu.pipeline_mode<synchronous>, transform_indices = @transform_6, window_bounds = array<i64: 32, 1>}, {pipeline_mode = #tpu.pipeline_mode<synchronous>, transform_indices = @transform_7, window_bounds = array<i64: 16, 32>}, {pipeline_mode = #tpu.pipeline_mode<synchronous>, transform_indices = @transform_8, window_bounds = array<i64: 16, 1>}, {pipeline_mode = #tpu.pipeline_mode<synchronous>, transform_indices = @transform_9, window_bounds = array<i64: 8, 8>}, {pipeline_mode = #tpu.pipeline_mode<synchronous>, transform_indices = @transform_10, window_bounds = array<i64: 8, 8>}, {pipeline_mode = #tpu.pipeline_mode<synchronous>, transform_indices = @transform_11, window_bounds = array<i64: 8, 1>}, {pipeline_mode = #tpu.pipeline_mode<synchronous>, transform_indices = @transform_12, window_bounds = array<i64: 2, 8>}, {pipeline_mode = #tpu.pipeline_mode<synchronous>, transform_indices = @transform_13, window_bounds = array<i64: 2, 1>}, {transform_indices = @transform_14, window_bounds = array<i64: 1, 8, 256>}, {transform_indices = @transform_15, window_bounds = array<i64: 1, 8, 256>}]} {
    %c0 = arith.constant 0 : index
    %c0_0 = arith.constant 0 : index
    %c0_1 = arith.constant 0 : index
    %0 = vector.load %arg1[%c0, %c0_0, %c0_1] : memref<1x8x256xf32, #tpu.memory_space<vmem>>, vector<1x8x256xf32>
    %1 = vector.shape_cast %0 : vector<1x8x256xf32> to vector<8x256xf32>
    %c0_2 = arith.constant 0 : index
    %c0_3 = arith.constant 0 : index
    %c0_4 = arith.constant 0 : index
    %2 = vector.load %arg2[%c0_2, %c0_3, %c0_4] : memref<1x8x256xf32, #tpu.memory_space<vmem>>, vector<1x8x256xf32>
    %3 = vector.shape_cast %2 : vector<1x8x256xf32> to vector<8x256xf32>
    %cst = arith.constant dense<0.000000e+00> : vector<8xf32>
    %4 = vector.multi_reduction <add>, %1, %cst [1] : vector<8x256xf32> to vector<8xf32>
    %5 = vector.shape_cast %4 : vector<8xf32> to vector<8x1xf32>
    %cst_5 = arith.constant 3.906250e-03 : f32
    %6 = vector.broadcast %cst_5 : f32 to vector<8x1xf32>
    %7 = arith.mulf %5, %6 : vector<8x1xf32>
    %cst_6 = arith.constant dense<0.000000e+00> : vector<8xf32>
    %8 = vector.multi_reduction <add>, %3, %cst_6 [1] : vector<8x256xf32> to vector<8xf32>
    %9 = vector.shape_cast %8 : vector<8xf32> to vector<8x1xf32>
    %cst_7 = arith.constant 3.906250e-03 : f32
    %10 = vector.broadcast %cst_7 : f32 to vector<8x1xf32>
    %11 = arith.mulf %9, %10 : vector<8x1xf32>
    %cst_8 = arith.constant dense<0xFF800000> : vector<8xf32>
    %12 = vector.multi_reduction <maximumf>, %1, %cst_8 [1] : vector<8x256xf32> to vector<8xf32>
    %13 = vector.shape_cast %12 : vector<8xf32> to vector<8x1xf32>
    %cst_9 = arith.constant dense<0xFF800000> : vector<8xf32>
    %14 = vector.multi_reduction <maximumf>, %3, %cst_9 [1] : vector<8x256xf32> to vector<8xf32>
    %15 = vector.shape_cast %14 : vector<8xf32> to vector<8x1xf32>
    %c0_10 = arith.constant 0 : index
    %c0_11 = arith.constant 0 : index
    %16 = vector.load %arg3[%c0_10, %c0_11] : memref<32x8xf32, #tpu.memory_space<vmem>>, vector<32x8xf32>
    %cst_12 = arith.constant dense<0.000000e+00> : vector<32x1xf32>
    %17 = tpu.matmul %16, %7, %cst_12 {dimension_numbers = #tpu.dot_dimension_numbers<[1], [0], [0], [1], [0, 0, 1, 1], [], []>} : vector<32x8xf32>, vector<8x1xf32>, vector<32x1xf32> -> vector<32x1xf32>
    %c0_13 = arith.constant 0 : index
    %c0_14 = arith.constant 0 : index
    %18 = vector.load %arg4[%c0_13, %c0_14] : memref<32x8xf32, #tpu.memory_space<vmem>>, vector<32x8xf32>
    %cst_15 = arith.constant dense<0.000000e+00> : vector<32x1xf32>
    %19 = tpu.matmul %18, %11, %cst_15 {dimension_numbers = #tpu.dot_dimension_numbers<[1], [0], [0], [1], [0, 0, 1, 1], [], []>} : vector<32x8xf32>, vector<8x1xf32>, vector<32x1xf32> -> vector<32x1xf32>
    %20 = arith.addf %17, %19 : vector<32x1xf32>
    %c0_16 = arith.constant 0 : index
    %c0_17 = arith.constant 0 : index
    %21 = vector.load %arg5[%c0_16, %c0_17] : memref<32x8xf32, #tpu.memory_space<vmem>>, vector<32x8xf32>
    %cst_18 = arith.constant dense<0.000000e+00> : vector<32x1xf32>
    %22 = tpu.matmul %21, %13, %cst_18 {dimension_numbers = #tpu.dot_dimension_numbers<[1], [0], [0], [1], [0, 0, 1, 1], [], []>} : vector<32x8xf32>, vector<8x1xf32>, vector<32x1xf32> -> vector<32x1xf32>
    %23 = arith.addf %20, %22 : vector<32x1xf32>
    %c0_19 = arith.constant 0 : index
    %c0_20 = arith.constant 0 : index
    %24 = vector.load %arg6[%c0_19, %c0_20] : memref<32x8xf32, #tpu.memory_space<vmem>>, vector<32x8xf32>
    %cst_21 = arith.constant dense<0.000000e+00> : vector<32x1xf32>
    %25 = tpu.matmul %24, %15, %cst_21 {dimension_numbers = #tpu.dot_dimension_numbers<[1], [0], [0], [1], [0, 0, 1, 1], [], []>} : vector<32x8xf32>, vector<8x1xf32>, vector<32x1xf32> -> vector<32x1xf32>
    %26 = arith.addf %23, %25 : vector<32x1xf32>
    %c0_22 = arith.constant 0 : index
    %c0_23 = arith.constant 0 : index
    %27 = vector.load %arg7[%c0_22, %c0_23] : memref<32x1xf32, #tpu.memory_space<vmem>>, vector<32x1xf32>
    %28 = arith.addf %26, %27 : vector<32x1xf32>
    %cst_24 = arith.constant 0.000000e+00 : f32
    %29 = vector.broadcast %cst_24 : f32 to vector<32x1xf32>
    %30 = arith.maximumf %28, %29 : vector<32x1xf32>
    %c0_25 = arith.constant 0 : index
    %c0_26 = arith.constant 0 : index
    %31 = vector.load %arg8[%c0_25, %c0_26] : memref<16x32xf32, #tpu.memory_space<vmem>>, vector<16x32xf32>
    %cst_27 = arith.constant dense<0.000000e+00> : vector<16x1xf32>
    %32 = tpu.matmul %31, %30, %cst_27 {dimension_numbers = #tpu.dot_dimension_numbers<[1], [0], [0], [1], [0, 0, 1, 1], [], []>} : vector<16x32xf32>, vector<32x1xf32>, vector<16x1xf32> -> vector<16x1xf32>
    %c0_28 = arith.constant 0 : index
    %c0_29 = arith.constant 0 : index
    %33 = vector.load %arg9[%c0_28, %c0_29] : memref<16x1xf32, #tpu.memory_space<vmem>>, vector<16x1xf32>
    %34 = arith.addf %32, %33 : vector<16x1xf32>
    %cst_30 = arith.constant 0.000000e+00 : f32
    %35 = vector.broadcast %cst_30 : f32 to vector<16x1xf32>
    %36 = arith.subf %35, %34 : vector<16x1xf32>
    %37 = math.exp %36 : vector<16x1xf32>
    %cst_31 = arith.constant 1.000000e+00 : f32
    %38 = vector.broadcast %cst_31 : f32 to vector<16x1xf32>
    %39 = arith.addf %38, %37 : vector<16x1xf32>
    %cst_32 = arith.constant 1.000000e+00 : f32
    %40 = vector.broadcast %cst_32 : f32 to vector<16x1xf32>
    %41 = arith.divf %40, %39 : vector<16x1xf32>
    %cst_33 = arith.constant 5.000000e-01 : f32
    %42 = vector.broadcast %cst_33 : f32 to vector<16x1xf32>
    %43 = arith.mulf %42, %41 : vector<16x1xf32>
    %44 = vector.extract_strided_slice %43 {offsets = [0, 0], sizes = [8, 1], strides = [1, 1]} : vector<16x1xf32> to vector<8x1xf32>
    %45 = vector.extract_strided_slice %43 {offsets = [8, 0], sizes = [8, 1], strides = [1, 1]} : vector<16x1xf32> to vector<8x1xf32>
    %c0_34 = arith.constant 0 : index
    %c0_35 = arith.constant 0 : index
    %46 = vector.load %arg10[%c0_34, %c0_35] : memref<8x8xf32, #tpu.memory_space<vmem>>, vector<8x8xf32>
    %cst_36 = arith.constant dense<0.000000e+00> : vector<8x256xf32>
    %47 = tpu.matmul %46, %1, %cst_36 {dimension_numbers = #tpu.dot_dimension_numbers<[1], [0], [0], [1], [0, 0, 1, 1], [], []>} : vector<8x8xf32>, vector<8x256xf32>, vector<8x256xf32> -> vector<8x256xf32>
    %c0_37 = arith.constant 0 : index
    %c0_38 = arith.constant 0 : index
    %48 = vector.load %arg11[%c0_37, %c0_38] : memref<8x8xf32, #tpu.memory_space<vmem>>, vector<8x8xf32>
    %cst_39 = arith.constant dense<0.000000e+00> : vector<8x256xf32>
    %49 = tpu.matmul %48, %3, %cst_39 {dimension_numbers = #tpu.dot_dimension_numbers<[1], [0], [0], [1], [0, 0, 1, 1], [], []>} : vector<8x8xf32>, vector<8x256xf32>, vector<8x256xf32> -> vector<8x256xf32>
    %50 = arith.addf %47, %49 : vector<8x256xf32>
    %c0_40 = arith.constant 0 : index
    %c0_41 = arith.constant 0 : index
    %51 = vector.load %arg12[%c0_40, %c0_41] : memref<8x1xf32, #tpu.memory_space<vmem>>, vector<8x1xf32>
    %52 = vector.broadcast %51 : vector<8x1xf32> to vector<8x256xf32>
    %53 = arith.addf %50, %52 : vector<8x256xf32>
    %cst_42 = arith.constant 0.000000e+00 : f32
    %54 = vector.broadcast %cst_42 : f32 to vector<8x256xf32>
    %55 = arith.maximumf %53, %54 : vector<8x256xf32>
    %c0_43 = arith.constant 0 : index
    %c0_44 = arith.constant 0 : index
    %56 = vector.load %arg13[%c0_43, %c0_44] : memref<2x8xf32, #tpu.memory_space<vmem>>, vector<2x8xf32>
    %cst_45 = arith.constant dense<0.000000e+00> : vector<2x256xf32>
    %57 = tpu.matmul %56, %55, %cst_45 {dimension_numbers = #tpu.dot_dimension_numbers<[1], [0], [0], [1], [0, 0, 1, 1], [], []>} : vector<2x8xf32>, vector<8x256xf32>, vector<2x256xf32> -> vector<2x256xf32>
    %c0_46 = arith.constant 0 : index
    %c0_47 = arith.constant 0 : index
    %58 = vector.load %arg14[%c0_46, %c0_47] : memref<2x1xf32, #tpu.memory_space<vmem>>, vector<2x1xf32>
    %59 = vector.broadcast %58 : vector<2x1xf32> to vector<2x256xf32>
    %60 = arith.addf %57, %59 : vector<2x256xf32>
    %cst_48 = arith.constant 0.000000e+00 : f32
    %61 = vector.broadcast %cst_48 : f32 to vector<2x256xf32>
    %62 = arith.subf %61, %60 : vector<2x256xf32>
    %63 = math.exp %62 : vector<2x256xf32>
    %cst_49 = arith.constant 1.000000e+00 : f32
    %64 = vector.broadcast %cst_49 : f32 to vector<2x256xf32>
    %65 = arith.addf %64, %63 : vector<2x256xf32>
    %cst_50 = arith.constant 1.000000e+00 : f32
    %66 = vector.broadcast %cst_50 : f32 to vector<2x256xf32>
    %67 = arith.divf %66, %65 : vector<2x256xf32>
    %cst_51 = arith.constant 5.000000e-01 : f32
    %68 = vector.broadcast %cst_51 : f32 to vector<2x256xf32>
    %69 = arith.mulf %68, %67 : vector<2x256xf32>
    %70 = vector.extract_strided_slice %69 {offsets = [0, 0], sizes = [1, 256], strides = [1, 1]} : vector<2x256xf32> to vector<1x256xf32>
    %71 = vector.extract_strided_slice %69 {offsets = [1, 0], sizes = [1, 256], strides = [1, 1]} : vector<2x256xf32> to vector<1x256xf32>
    %72 = vector.broadcast %45 : vector<8x1xf32> to vector<8x256xf32>
    %73 = vector.broadcast %71 : vector<1x256xf32> to vector<8x256xf32>
    %74 = arith.addf %72, %73 : vector<8x256xf32>
    %75 = arith.mulf %74, %3 : vector<8x256xf32>
    %76 = arith.addf %1, %75 : vector<8x256xf32>
    %c0_52 = arith.constant 0 : index
    %c0_53 = arith.constant 0 : index
    %c0_54 = arith.constant 0 : index
    %77 = vector.load %arg15[%c0_52, %c0_53, %c0_54] : memref<1x8x256xf32, #tpu.memory_space<vmem>>, vector<1x8x256xf32>
    %78 = vector.shape_cast %77 : vector<1x8x256xf32> to vector<8x256xf32>
    %79 = vector.shape_cast %76 : vector<8x256xf32> to vector<1x8x256xf32>
    tpu.vector_store %arg15[%c0_52, %c0_53, %c0_54], %79 {strides = array<i32>} : memref<1x8x256xf32, #tpu.memory_space<vmem>>, vector<1x8x256xf32>,
    %80 = vector.broadcast %44 : vector<8x1xf32> to vector<8x256xf32>
    %81 = vector.broadcast %70 : vector<1x256xf32> to vector<8x256xf32>
    %82 = arith.addf %80, %81 : vector<8x256xf32>
    %83 = arith.mulf %82, %1 : vector<8x256xf32>
    %84 = arith.addf %3, %83 : vector<8x256xf32>
    %c0_55 = arith.constant 0 : index
    %c0_56 = arith.constant 0 : index
    %c0_57 = arith.constant 0 : index
    %85 = vector.load %arg16[%c0_55, %c0_56, %c0_57] : memref<1x8x256xf32, #tpu.memory_space<vmem>>, vector<1x8x256xf32>
    %86 = vector.shape_cast %85 : vector<1x8x256xf32> to vector<8x256xf32>
    %87 = vector.shape_cast %84 : vector<8x256xf32> to vector<1x8x256xf32>
    tpu.vector_store %arg16[%c0_55, %c0_56, %c0_57], %87 {strides = array<i32>} : memref<1x8x256xf32, #tpu.memory_space<vmem>>, vector<1x8x256xf32>,
    return
  }
  func.func @transform_0(%arg0: i32) -> (i32, i32, i32) {
    %c0_i32 = arith.constant 0 : i32
    %c0_i32_0 = arith.constant 0 : i32
    %c0_i32_1 = arith.constant 0 : i32
    return %arg0, %c0_i32, %c0_i32_0 : i32, i32, i32
  }
  func.func @transform_1(%arg0: i32) -> (i32, i32, i32) {
    %c0_i32 = arith.constant 0 : i32
    %c0_i32_0 = arith.constant 0 : i32
    %c0_i32_1 = arith.constant 0 : i32
    return %arg0, %c0_i32, %c0_i32_0 : i32, i32, i32
  }
  func.func @transform_2(%arg0: i32) -> (i32, i32) {
    %c0_i32 = arith.constant 0 : i32
    %c0_i32_0 = arith.constant 0 : i32
    %c0_i32_1 = arith.constant 0 : i32
    return %c0_i32, %c0_i32_0 : i32, i32
  }
  func.func @transform_3(%arg0: i32) -> (i32, i32) {
    %c0_i32 = arith.constant 0 : i32
    %c0_i32_0 = arith.constant 0 : i32
    %c0_i32_1 = arith.constant 0 : i32
    return %c0_i32, %c0_i32_0 : i32, i32
  }
  func.func @transform_4(%arg0: i32) -> (i32, i32) {
    %c0_i32 = arith.constant 0 : i32
    %c0_i32_0 = arith.constant 0 : i32
    %c0_i32_1 = arith.constant 0 : i32
    return %c0_i32, %c0_i32_0 : i32, i32
  }
  func.func @transform_5(%arg0: i32) -> (i32, i32) {
    %c0_i32 = arith.constant 0 : i32
    %c0_i32_0 = arith.constant 0 : i32
    %c0_i32_1 = arith.constant 0 : i32
    return %c0_i32, %c0_i32_0 : i32, i32
  }
  func.func @transform_6(%arg0: i32) -> (i32, i32) {
    %c0_i32 = arith.constant 0 : i32
    %c0_i32_0 = arith.constant 0 : i32
    %c0_i32_1 = arith.constant 0 : i32
    return %c0_i32, %c0_i32_0 : i32, i32
  }
  func.func @transform_7(%arg0: i32) -> (i32, i32) {
    %c0_i32 = arith.constant 0 : i32
    %c0_i32_0 = arith.constant 0 : i32
    %c0_i32_1 = arith.constant 0 : i32
    return %c0_i32, %c0_i32_0 : i32, i32
  }
  func.func @transform_8(%arg0: i32) -> (i32, i32) {
    %c0_i32 = arith.constant 0 : i32
    %c0_i32_0 = arith.constant 0 : i32
    %c0_i32_1 = arith.constant 0 : i32
    return %c0_i32, %c0_i32_0 : i32, i32
  }
  func.func @transform_9(%arg0: i32) -> (i32, i32) {
    %c0_i32 = arith.constant 0 : i32
    %c0_i32_0 = arith.constant 0 : i32
    %c0_i32_1 = arith.constant 0 : i32
    return %c0_i32, %c0_i32_0 : i32, i32
  }
  func.func @transform_10(%arg0: i32) -> (i32, i32) {
    %c0_i32 = arith.constant 0 : i32
    %c0_i32_0 = arith.constant 0 : i32
    %c0_i32_1 = arith.constant 0 : i32
    return %c0_i32, %c0_i32_0 : i32, i32
  }
  func.func @transform_11(%arg0: i32) -> (i32, i32) {
    %c0_i32 = arith.constant 0 : i32
    %c0_i32_0 = arith.constant 0 : i32
    %c0_i32_1 = arith.constant 0 : i32
    return %c0_i32, %c0_i32_0 : i32, i32
  }
  func.func @transform_12(%arg0: i32) -> (i32, i32) {
    %c0_i32 = arith.constant 0 : i32
    %c0_i32_0 = arith.constant 0 : i32
    %c0_i32_1 = arith.constant 0 : i32
    return %c0_i32, %c0_i32_0 : i32, i32
  }
  func.func @transform_13(%arg0: i32) -> (i32, i32) {
    %c0_i32 = arith.constant 0 : i32
    %c0_i32_0 = arith.constant 0 : i32
    %c0_i32_1 = arith.constant 0 : i32
    return %c0_i32, %c0_i32_0 : i32, i32
  }
  func.func @transform_14(%arg0: i32) -> (i32, i32, i32) {
    %c0_i32 = arith.constant 0 : i32
    %c0_i32_0 = arith.constant 0 : i32
    %c0_i32_1 = arith.constant 0 : i32
    return %arg0, %c0_i32, %c0_i32_0 : i32, i32, i32
  }
  func.func @transform_15(%arg0: i32) -> (i32, i32, i32) {
    %c0_i32 = arith.constant 0 : i32
    %c0_i32_0 = arith.constant 0 : i32
    %c0_i32_1 = arith.constant 0 : i32
    return %arg0, %c0_i32, %c0_i32_0 : i32, i32, i32
  }
}

</mosaic_0001>

<bundles_post_ra>
// kernel: tpu_custom_call.1
= control target key start
LH: loop header
LB: loop body
LE: loop exit
PB: predicated region body
PF: predicated region fallthrough
CT: control target
= control target key end

     0   :  { %s2151_s0 = inlined_call_operand.vmem [shape: f32[2,8,256], index: 0, kind: input, shape index: {}]   ;;  %s2152_s1 = inlined_call_operand.vmem [shape: f32[2,8,256], index: 1, kind: input, shape index: {}]   ;;  %s2153_s2 = inlined_call_operand.vmem [shape: f32[32,8], index: 2, kind: input, shape index: {}]   ;;  %s2154_s3 = inlined_call_operand.vmem [shape: f32[32,8], index: 3, kind: input, shape index: {}]   ;;  %s2155_s4 = inlined_call_operand.vmem [shape: f32[32,8], index: 4, kind: input, shape index: {}]   ;;  %s2156_s5 = inlined_call_operand.vmem [shape: f32[32,8], index: 5, kind: input, shape index: {}]   ;;  %s2157_s6 = inlined_call_operand.vmem [shape: f32[32,1], index: 6, kind: input, shape index: {}]   ;;  %s2158_s7 = inlined_call_operand.vmem [shape: f32[16,32], index: 7, kind: input, shape index: {}]   ;;  %s2159_s8 = inlined_call_operand.vmem [shape: f32[16,1], index: 8, kind: input, shape index: {}]   ;;  %s2160_s9 = inlined_call_operand.vmem [shape: f32[8,8], index: 9, kind: input, shape index: {}]   ;;  %s2161_s10 = inlined_call_operand.vmem [shape: f32[8,8], index: 10, kind: input, shape index: {}]   ;;  %s2162_s11 = inlined_call_operand.vmem [shape: f32[8,1], index: 11, kind: input, shape index: {}]   ;;  %s2163_s12 = inlined_call_operand.vmem [shape: f32[2,8], index: 12, kind: input, shape index: {}]   ;;  %s2164_s13 = inlined_call_operand.vmem [shape: f32[2,1], index: 13, kind: input, shape index: {}]   ;;  %s2165_s14 = inlined_call_operand.hbm [shape: f32[2,8,256], index: 14, kind: output, shape index: {0}]   ;;  %s2166_s15 = inlined_call_operand.hbm [shape: f32[2,8,256], index: 15, kind: output, shape index: {1}]  }
   0x1   :  { %2168 = sst [smem:[#allocation10_spill]] %s2151_s0 }
   0x2   :  { %2169 = sst [smem:[#allocation11_spill]] %s2152_s1 }
   0x3   :  { %2170 = sst [smem:[#allocation12_spill]] %s2153_s2 }
   0x4   :  { %2171 = sst [smem:[#allocation13_spill]] %s2154_s3 }
   0x5   :  { %2172 = sst [smem:[#allocation14_spill]] %s2155_s4 }
   0x6   :  { %2173 = sst [smem:[#allocation15_spill]] %s2156_s5 }
   0x7   :  { %21 = vsyncpa [#allocation3], 0 }
   0x8   :  { %23 = vsyncpa [#allocation3 + $0x1], 0 }
   0x9   :  { %24 = vsyncpa [#allocation5], 0 }
   0xa   :  { %26 = vsyncpa [#allocation5 + $0x1], 0  ;;  %s1879_s18 = smov 0   ;;  %s1881_s19 = smov 0  }
   0xb   :  { %s1883_s20 = smov 0   ;;  %s1885_s21 = smov 0  }
   0xc LB: > { %2174 = sst [smem:[#allocation8_spill]] %s1789_s20  ;;  %s1900_s22 = sadd.s32 4294967295, %s1793_s21   ;;  %s1793_s21 = sphi %s1885_s21, %s2188_s21   ;;  %s1789_s20 = sphi %s1883_s20, %s2185_s20   ;;  %s1785_s19 = sphi %s1881_s19, %s2187_s19   ;;  %s1781_s18 = sphi %s1879_s18, %s2186_s18  }
   0xd   : > { %s1501_s23 = sadd.s32 4294967294, %s1793_s21   ;;  %s1904_s24 = sadd.s32 1, %s1793_s21  }
   0xe   : > { %s343_s25 = sadd.s32 1, %s1789_s20  ;;  %s340_s26 = ssub.s32 %s1793_s21, %s1904_s24 }
   0xf   : > { %p353_p0 = scmp.ne.s32.totalorder %s1789_s20, %s1785_s19  ;;  %p341_p1 = scmp.eq.s32.totalorder %s340_s26, 0 }
  0x10   : > { %p354_p2 = scmp.eq.s32.totalorder %s1900_s22, 1  ;;  %p359_p3 = scmp.ne.s32.totalorder %s1785_s19, %s1781_s18 }
  0x11   : > { %p360_p4 = scmp.eq.s32.totalorder %s1501_s23, 1  ;;  %p1504_p7 = scmp.ge.s32.totalorder %s1793_s21, 1 }
  0x12   : > { %s1915_s27 = scalar_select %p341_p1, %s1789_s20, %s343_s25  }
  0x13   : > { %p1917_p5 = por %p354_p2, %p353_p0  ;;  %p1921_p6 = por %p360_p4, %p359_p3 }
  0x14   : > { %2175 = sst [smem:[#allocation9_spill]] %s1915_s27  ;;  %p456_p8 = scmp.lt.s32.totalorder %s1793_s21, 3 }
  0x16   : > { %p457_p9 = pnand %p1504_p7, %p456_p8 }
  0x17   : > { %p514_p10 = scmp.lt.s32.totalorder (!%p457_p9), %s1900_s22, 1  ;;  %s2178_s0 = sld [smem:[#allocation10_spill]] (!%p457_p9)  ;;  %vm550_vm0 = vcmask (!%p457_p9), 64512   ;;  %v967_v30 = vld [vmem:[%s2158_s7] sm:$0xff] (!%p457_p9)  ;;  %vm971_vm1 = vcmask (!%p457_p9), 261120   ;;  %v1795_v32 = vmov (!%p457_p9), 0  }
  0x18   : > { %460 = sbr.rel (%p457_p9) target bundleno = 950 (0x3b6), region = 76  ;;  %s2179_s1 = sld [smem:[#allocation11_spill]] (!%p457_p9)  ;;  %v1217_v31 = vld [vmem:[%s2162_s11] sm:$0xff] (!%p457_p9)  ;;  %1681 = vset.pattern.permute.xlu0 (!%p457_p9), %v1795_v32  ;;  %1682 = vset.pattern.permute.xlu1 (!%p457_p9), %v1795_v32  ;;  %v956_v38 = vld [vmem:[%s2157_s6 + $0x8] sm:$0xff] (!%p457_p9)  ;;  %v958_v46 = vld [vmem:[%s2157_s6 + $0x18] sm:$0xff] (!%p457_p9)  ;;  %v1796_v60 = vmov (!%p457_p9), 0.0  }
  0x19   : > { %s2180_s2 = sld [smem:[#allocation12_spill]] (!%p457_p9)  ;;  %s2181_s3 = sld [smem:[#allocation13_spill]] (!%p457_p9)  ;;  %v955_v41 = vld [vmem:[%s2157_s6] sm:$0xff] (!%p457_p9)  ;;  %v957_v50 = vld [vmem:[%s2157_s6 + $0x10] sm:$0xff] (!%p457_p9)  ;;  %v968_v59 = vld [vmem:[%s2158_s7 + $0x8] sm:$0xff] (!%p457_p9) }
  0x1a   : > { %s2182_s4 = sld [smem:[#allocation14_spill]] (!%p457_p9)  ;;  %s2183_s5 = sld [smem:[#allocation15_spill]] (!%p457_p9)  ;;  %v1068_v61 = vld [vmem:[%s2161_s10] sm:$0xff] (!%p457_p9) }
  0x1b   : > { %v1067_v62 = vld [vmem:[%s2160_s9] sm:$0xff] (!%p457_p9)  ;;  %s1542_s17 = sshll.u32 (!%p457_p9), %s1900_s22, 8 }
  0x1c   : > { %v1228_v63 = vld [vmem:[%s2164_s13] sm:$0x3] (!%p457_p9) }
  0x1f   : > { %s515_s30 = scalar_select %p514_p10, %s1900_s22, 1  ;;  %v542_v8 = vld [vmem:[%s2180_s2] sm:$0xff]  ;;  %v543_v13 = vld [vmem:[%s2180_s2 + $0x8] sm:$0xff]  ;;  %v544_v15 = vld [vmem:[%s2180_s2 + $0x10] sm:$0xff] }
  0x20   : > { %1580 = vmatprep.mubr.msk.f32.mxu0 %vm550_vm0, %v542_v8  ;;  %v546_v9 = vld [vmem:[%s2181_s3] sm:$0xff]  ;;  %v547_v18 = vld [vmem:[%s2181_s3 + $0x8] sm:$0xff]  ;;  %v545_v19 = vld [vmem:[%s2180_s2 + $0x18] sm:$0xff]  ;;  %s2076_s22 = scalar_lea.hbm %s2165_s14, %s1542_s17  ;;  %s2086_s2 = scalar_lea.hbm %s2166_s15, %s1542_s17 }
  0x21   : > { %s1540_s16 = sshll.u32 %s515_s30, 4  ;;  %1572 = vmatprep.mubr.msk.f32.mxu1 %vm550_vm0, %v546_v9  ;;  %v548_v20 = vld [vmem:[%s2181_s3 + $0x10] sm:$0xff]  ;;  %v745_v21 = vld [vmem:[%s2182_s4] sm:$0xff]  ;;  %v549_v22 = vld [vmem:[%s2181_s3 + $0x18] sm:$0xff]  ;;  %s1797_s3 = smov [#allocation2]  }
  0x22   : > { %s518_s25 = scalar_lea.vmem %s2178_s0, %s1540_s16  ;;  %s523_s20 = scalar_lea.vmem %s2179_s1, %s1540_s16  ;;  %v746_v23 = vld [vmem:[%s2182_s4 + $0x8] sm:$0xff]  ;;  %v747_v24 = vld [vmem:[%s2182_s4 + $0x10] sm:$0xff]  ;;  %v748_v25 = vld [vmem:[%s2182_s4 + $0x18] sm:$0xff] }
  0x23   : > { %v1935_v0 = vld [vmem:[%s518_s25] sm:$0xff]  ;;  %v1937_v1 = vld [vmem:[%s518_s25 + $0x8] sm:$0xff]  ;;  %v852_v28 = vld [vmem:[%s2183_s5 + $0x10] sm:$0xff]  ;;  %s1703_s4 = sshll.u32 %s1797_s3, 4  ;;  %s1704_s4 = int_to_ptr.vmem [resolvable:$false] %s1703_s4 }
  0x24   : > { %v1939_v2 = vld [vmem:[%s523_s20] sm:$0xff]  ;;  %v528_v3 = vadd.f32 %v1937_v1, %v1935_v0  ;;  %v1943_v4 = vld [vmem:[%s523_s20 + $0x8] sm:$0xff]  ;;  %v536_v6 = vmax.f32 %v1935_v0, %v1937_v1  ;;  %v853_v29 = vld [vmem:[%s2183_s5 + $0x18] sm:$0xff]  ;;  %s2064_s20 = sand.u32 1, %s1785_s19  }
  0x25   : > { %v532_v5 = vadd.f32 %v1943_v4, %v1939_v2  ;;  %v539_v7 = vmax.f32 %v1939_v2, %v1943_v4  ;;  %v850_v26 = vld [vmem:[%s2183_s5] sm:$0xff]  ;;  %v851_v27 = vld [vmem:[%s2183_s5 + $0x8] sm:$0xff]  ;;  %s1505_s16 = sshll.u32 %s2064_s20, 4  ;;  %s1365_s0 = scalar_lea.sflag [#allocation3], %s2064_s20 }
  0x26   : > { %529 = vadd.xlane.f32.xlu0 %v528_v3  ;;  %v970_v3 = vld [vmem:[%s2159_s8 + $0x8] sm:$0xff]  ;;  %s506_s23 = scalar_lea.vmem [#allocation2], %s1505_s16  ;;  %s513_s26 = scalar_lea.vmem [#allocation4], %s1505_s16 }
  0x27   : > { %533 = vadd.xlane.f32.xlu1 %v532_v5  ;;  %v969_v5 = vld [vmem:[%s2159_s8] sm:$0xff]  ;;  %s1384_s25 = sshll.u32 %s506_s23, 4  ;;  %s1398_s27 = sshll.u32 %s513_s26, 4  ;;  %s2080_s25 = int_to_ptr.vmem [resolvable:$true] %s1384_s25  ;;  %s2088_s27 = int_to_ptr.vmem [resolvable:$true] %s1398_s27 }
  0x28   : > { %s1699_s30 = scalar_lea.vmem %s2080_s25, 256  ;;  %s1705_s5 = scalar_lea.vmem %s1704_s4, 512 }
  0x29   : > { %p1700_p11 = scmp.ne.s32.totalorder %s2080_s25, %s1699_s30  ;;  %p1706_p0 = scmp.lt.s32.totalorder %s2080_s25, %s1704_s4 }
  0x2a   : > { %537 = vmax.xlane.f32.xlu0 %v536_v6  ;;  %p1707_p1 = scmp.lt.s32.totalorder %s1705_s5, %s1699_s30 }
  0x2b   : > { %540 = vmax.xlane.f32.xlu1 %v539_v7  ;;  %p1701_p12 = pnand %p1700_p11, %p1917_p5 }
  0x2c   : > { %p1708_p2 = por %p1707_p1, %p1706_p0 }
  0x2d   : > { %p1702_p13 = pneg %p1701_p12 }
  0x2f   : > { %p1709_p3 = pnand %p1708_p2, %p1702_p13 }
  0x3c   : > { %1231 = vperm.xlu1 %1682, %v1228_v63  }
  0x40   : > { %1220 = vperm.xlu0 %1681, %v1217_v31  }
  0xb3   : > { %v530_v10 = vpop.xlane.xlu0 %529 }
  0xb4   : > { %v531_v11 = vmul.f32 0.00390625, %v530_v10  ;;  %v534_v12 = vpop.xlane.xlu1 %533 }
  0xb5   : > { %v535_v14 = vmul.f32 0.00390625, %v534_v12 }
  0xb6   : > { %1578 = vmatprep.subr.mxu0 %v531_v11 }
  0xb7   : > { %1579 = vmatpush3.msra.mxu0 %v531_v11  ;;  %v538_v16 = vpop.xlane.xlu0 %537  ;;  %1570 = vmatprep.subr.mxu1 %v535_v14 }
  0xb8   : > { %1581 = vmatmul.mubr.msk.f32.vlgmr.msra.gmra.mrb[0].mxu0 %vm550_vm0, %v543_v13  ;;  %1586 = vmatprep.subr.mxu0 %v538_v16  ;;  %v541_v17 = vpop.xlane.xlu1 %540 }
  0xb9   : > { %1587 = vmatpush3.msra.mxu0 %v538_v16  ;;  %1583 = vmatprep.mubr.msk.f32.mxu0 %vm550_vm0, %v544_v15 }
  0xba   : > { %1571 = vmatpush3.msra.mxu1 %v535_v14  ;;  %1594 = vmatprep.subr.mxu0 %v541_v17 }
  0xbb   : > { %1573 = vmatmul.mubr.msk.f32.vlgmr.msra.gmra.mrb[0].mxu1 %vm550_vm0, %v547_v18 }
  0xbc   : > { %1584 = vmatmul.mubr.msk.f32.gmra.mrb[2].mxu0 %vm550_vm0, %v545_v19  ;;  %1575 = vmatprep.mubr.msk.f32.mxu1 %vm550_vm0, %v548_v20 }
  0xbd   : > { %1588 = vmatprep.mubr.msk.f32.mxu0 %vm550_vm0, %v745_v21 }
  0xbf   : > { %1576 = vmatmul.mubr.msk.f32.gmra.mrb[2].mxu1 %vm550_vm0, %v549_v22  ;;  %v1221_v14 = vpop.permute.xlu0 %1220  ;;  %v1227_v22 = vld [vmem:[%s2163_s12] sm:$0x3] }
  0xc0   : > { %1589 = vmatmul.mubr.msk.f32.vlgmr.msra.gmra.mrb[0].mxu0 %vm550_vm0, %v746_v23  ;;  %1610 = vmatprep.mubr.msk.f32.mxu1 %vm971_vm1, %v967_v30  ;;  %v1232_v30 = vpop.permute.xlu1 %1231 }
  0xc1   : > { %1595 = vmatpush3.msra.mxu0 %v541_v17  ;;  %1591 = vmatprep.mubr.msk.f32.mxu0 %vm550_vm0, %v747_v24 }
  0xc4   : > { %1592 = vmatmul.mubr.msk.f32.gmra.mrb[2].mxu0 %vm550_vm0, %v748_v25 }
  0xc5   : > { %1596 = vmatprep.mubr.msk.f32.mxu0 %vm550_vm0, %v850_v26 }
  0xc8   : > { %1597 = vmatmul.mubr.msk.f32.vlgmr.msra.gmra.mrb[0].mxu0 %vm550_vm0, %v851_v27 }
  0xc9   : > { %1599 = vmatprep.mubr.msk.f32.mxu0 %vm550_vm0, %v852_v28 }
  0xcc   : > { %1600 = vmatmul.mubr.msk.f32.gmra.mrb[2].mxu0 %vm550_vm0, %v853_v29 }
 0x18e   : > { %v1574_v33 = vpop.f32.mrb[0].mxu1 }
 0x18f   : > { %v629_v34 = vpop.f32.mrb[1].mxu1 }
 0x192   : > { %v1577_v35 = vpop.f32.mrb[2].mxu1 }
 0x193   : > { %v639_v36 = vpop.f32.mrb[3].mxu1 }
 0x19b   : > { %v1598_v37 = vpop.f32.mrb[0].mxu0 }
 0x19c   : > { %v1621_v39 = vadd.f32 %v1598_v37, %v1574_v33  ;;  %v932_v40 = vpop.f32.mrb[1].mxu0 }
 0x19d   : > { %v1622_v42 = vadd.f32 %v932_v40, %v629_v34 }
 0x19e   : > { %v960_v43 = vadd.f32 %v1621_v39, %v956_v38 }
 0x19f   : > { %v959_v44 = vadd.f32 %v1622_v42, %v955_v41  ;;  %v1601_v45 = vpop.f32.mrb[2].mxu0 }
 0x1a0   : > { %v964_v47 = vmax.f32 %v960_v43, 0.0  ;;  %v1623_v48 = vadd.f32 %v1601_v45, %v1577_v35  ;;  %v942_v49 = vpop.f32.mrb[3].mxu0  ;;  %v1327_v43 = vlaneseq }
 0x1a1   : > { %v963_v51 = vmax.f32 %v959_v44, 0.0  ;;  %v1624_v52 = vadd.f32 %v942_v49, %v639_v36 }
 0x1a2   : > { %v962_v53 = vadd.f32 %v1623_v48, %v958_v46  ;;  %v1328_v44 = vshrl.u32 %v1327_v43, 7 }
 0x1a3   : > { %v961_v54 = vadd.f32 %v1624_v52, %v957_v50  ;;  %v1613_v55 = vpack.c.bf16 %v964_v47, %v963_v51 }
 0x1a4   : > { %v966_v56 = vmax.f32 %v962_v53, 0.0  ;;  %v1329_v46 = vsub.s32 1, %v1328_v44  ;;  %v1350_v47 = vsub.s32 0, %v1328_v44 }
 0x1a5   : > { %v965_v57 = vmax.f32 %v961_v54, 0.0  ;;  %1614 = vmatprep.subr.bf16.mxu1 %v1613_v55 }
 0x1a6   : > { %1616 = vmatpush3.bf16.msra.mxu1 %v1613_v55 }
 0x1a7   : > { %v1617_v58 = vpack.c.bf16 %v966_v56, %v965_v57 }
 0x1a9   : > { %1618 = vmatprep.subr.bf16.mxu1 %v1617_v58 }
 0x1aa   : > { %1620 = vmatpush3.bf16.msra.mxu1 %v1617_v58 }
 0x1ab   : > { %1072 = vmatprep.subr.mxu1 %v1943_v4 }
 0x1ad   : > { %1611 = vmatmul.mubr.msk.f32.vlgmr.msra.gmra.mrb[4].mxu1 %vm971_vm1, %v968_v59 }
 0x1ae   : > { %1073 = vmatpush1.msra.mxu1 %v1939_v2  ;;  %1136 = vmatprep.mubr.f32.mxu1 %v1796_v60 }
 0x1af   : > { %1146 = vmatprep.subr.mxu1 %v1937_v1 }
 0x1b1   : > { %1529 = vmatmul.mubr.msk.f32.vlgmr.msra.gmra.mrb[6].mxu1 %vm550_vm0, %v1068_v61 }
 0x1b2   : > { %1147 = vmatpush1.msra.mxu1 %v1935_v0  ;;  %1210 = vmatprep.mubr.f32.mxu1 %v1796_v60 }
 0x1b9   : > { %1530 = vmatmul.mubr.msk.f32.vlgmr.msra.gmra.mrb[6].mxu1 %vm550_vm0, %v1067_v62 }
 0x1ba   : > { %1301 = vmatprep.mubr.f32.mxu1 %v1796_v60 }
 0x280   : > { %v1612_v6 = vpop.f32.mrb[4].mxu1 }
 0x281   : > { %v1050_v7 = vadd.f32 %v1612_v6, %v970_v3  ;;  %v1044_v8 = vpop.f32.mrb[5].mxu1 }
 0x282   : > { %v1045_v9 = vadd.f32 %v1044_v8, %v969_v5 }
 0x283   : > { %v1054_v10 = vsub.f32 0.0, %v1050_v7 }
 0x284   : > { %v1053_v11 = vsub.f32 0.0, %v1045_v9 }
 0x285   : > { %v1057_v12 = vmul.f32 1.442695, %v1054_v10 }
 0x286   : > { %v1055_v13 = vmul.f32 1.442695, %v1053_v11 }
 0x287   : > { %1683 = vpow2.f32 %v1057_v12 }
 0x288   : > { %1685 = vpow2.f32 %v1055_v13 }
 0x28c   : > { %v1212_v15 = vpop.f32.mrb[6].mxu1 }
 0x28d   : > { %v1223_v16 = vadd.f32 %v1221_v14, %v1212_v15  ;;  %v1214_v17 = vpop.f32.mrb[7].mxu1 }
 0x28e   : > { %v1224_v18 = vadd.f32 %v1221_v14, %v1214_v17 }
 0x28f   : > { %v1225_v21 = vmax.f32 %v1223_v16, 0.0 }
 0x290   : > { %v1226_v19 = vmax.f32 %v1224_v18, 0.0 }
 0x291   : > { %v1684_v20 = vpop.eup %1683 }
 0x292   : > { %v1686_v23 = vpop.eup %1685  ;;  %v1060_v24 = vadd.f32 1.0, %v1684_v20  ;;  %1237 = vmatprep.subr.mxu1 %v1226_v19 }
 0x293   : > { %v1059_v25 = vadd.f32 1.0, %v1686_v23  ;;  %1238 = vmatpush1.msra.mxu1 %v1225_v21 }
 0x294   : > { %1687 = vrcp.f32 %v1060_v24  ;;  %1531 = vmatmul.mubr.msk.f32.vlgmr.msra.gmra.mrb[8].mxu1 %vm550_vm0, %v1227_v22 }
 0x295   : > { %1689 = vrcp.f32 %v1059_v25 }
 0x29e   : > { %v1688_v26 = vpop.eup %1687 }
 0x29f   : > { %v1066_v27 = vmul.f32 0.5, %v1688_v26  ;;  %v1690_v28 = vpop.eup %1689 }
 0x2a0   : > { %v1065_v29 = vmul.f32 0.5, %v1690_v28 }
 0x2a1   : > { %1324 = vperm.xlu1 %1682, %v1066_v27  }
 0x2a5   : > { %1345 = vperm.xlu1 %1682, %v1065_v29  }
 0x320   : > { %v1325_v45 = vpop.permute.xlu1 %1324 }
 0x324   : > { %v1346_v54 = vpop.permute.xlu1 %1345 }
 0x367   : > { %v1303_v31 = vpop.f32.mrb[8].mxu1 }
 0x368   : > { %v1304_v32 = vadd.f32 %v1303_v31, %v1232_v30  ;;  %v1305_v33 = vpop.f32.mrb[9].mxu1 }
 0x369   : > { %v1306_v34 = vadd.f32 %v1305_v33, %v1232_v30 }
 0x36a   : > { %v1308_v35 = vsub.f32 0.0, %v1304_v32 }
 0x36b   : > { %v1309_v36 = vsub.f32 0.0, %v1306_v34 }
 0x36c   : > { %v1310_v37 = vmul.f32 1.442695, %v1308_v35 }
 0x36d   : > { %v1312_v38 = vmul.f32 1.442695, %v1309_v36 }
 0x36e   : > { %1691 = vpow2.f32 %v1310_v37 }
 0x36f   : > { %1693 = vpow2.f32 %v1312_v38 }
 0x378   : > { %v1692_v39 = vpop.eup %1691 }
 0x379   : > { %v1694_v40 = vpop.eup %1693  ;;  %v1314_v41 = vadd.f32 1.0, %v1692_v39 }
 0x37a   : > { %v1315_v42 = vadd.f32 1.0, %v1694_v40 }
 0x37b   : > { %1695 = vrcp.f32 %v1314_v41 }
 0x37c   : > { %1697 = vrcp.f32 %v1315_v42 }
 0x385   : > { %v1696_v48 = vpop.eup %1695 }
 0x386   : > { %v1698_v49 = vpop.eup %1697  ;;  %v1320_v50 = vmul.f32 0.5, %v1696_v48 }
 0x387   : > { %v1321_v51 = vmul.f32 0.5, %v1698_v49 }
 0x388   : > { %v1330_v52 = vrot.slane %v1320_v50, %v1329_v46  ;;  %v1351_v53 = vrot.slane %v1320_v50, %v1350_v47 }
 0x389   : > { %v1334_v55 = vrot.slane %v1321_v51, %v1329_v46  ;;  %v1355_v56 = vrot.slane %v1321_v51, %v1350_v47 }
 0x38a   : > { %v1335_v57 = vadd.f32 %v1330_v52, %v1325_v45  ;;  %v1356_v58 = vadd.f32 %v1351_v53, %v1346_v54 }
 0x38b   : > { %v1336_v59 = vadd.f32 %v1334_v55, %v1325_v45  ;;  %v1357_v60 = vadd.f32 %v1355_v56, %v1346_v54 }
 0x38c   : > { %v1337_v61 = vmul.f32 %v1335_v57, %v1939_v2  ;;  %v1358_v62 = vmul.f32 %v1356_v58, %v1935_v0 }
 0x38d   : > { %v1338_v63 = vmul.f32 %v1336_v59, %v1943_v4  ;;  %v1359_v3 = vmul.f32 %v1357_v60, %v1937_v1 }
 0x38e   : > { %v1339_v5 = vadd.f32 %v1337_v61, %v1935_v0  ;;  %v1360_v6 = vadd.f32 %v1358_v62, %v1939_v2 }
 0x38f   : > { %v1340_v7 = vadd.f32 %v1338_v63, %v1937_v1  ;;  %v1361_v8 = vadd.f32 %v1359_v3, %v1943_v4 }
 0x390   : > { %1341 = vst [vmem:[%s506_s23] sm:$0xff] %v1339_v5  ;;  %1362 = vst [vmem:[%s513_s26] sm:$0xff] %v1360_v6 }
 0x391   : > { %1342 = vst [vmem:[%s506_s23 + $0x8] sm:$0xff] %v1340_v7  ;;  %1363 = vst [vmem:[%s513_s26 + $0x8] sm:$0xff] %v1361_v8 }
 0x392   : > { %1712 = shalt.err (!%p1709_p3)
}
 0x393   : > { %s1713_s1 = scalar_lea.hbm %s2076_s22, 256  ;;  %s1717_s3 = scalar_lea.hbm %s2165_s14, 512 }
 0x394   : > { %p1714_p4 = scmp.ne.s32.totalorder %s2076_s22, %s1713_s1  ;;  %p1718_p9 = scmp.lt.u32.totalorder %s2076_s22, %s2165_s14 }
 0x395   : > { %p1719_p10 = scmp.lt.u32.totalorder %s1717_s3, %s1713_s1  ;;  %p1721_p12 = scmp.lt.u32.totalorder %s1713_s1, %s2076_s22 }
 0x396   : > { %p1715_p7 = pnand %p1714_p4, %p1917_p5 }
 0x397   : > { %p1720_p11 = por %p1719_p10, %p1718_p9 }
 0x398   : > { %p1716_p8 = pneg %p1715_p7 }
 0x399   : > { %p1722_p13 = por %p1721_p12, %p1720_p11 }
 0x39b   : > { %p1723_p0 = pnand %p1722_p13, %p1716_p8 }
 0x39d   : > { %1726 = shalt.err (!%p1723_p0)
}
 0x39e   : > { %1635 = dma.vmem_to_hbm [thread:$0]  (%p1917_p5), %s2080_s25, 256, %s2076_s22, %s1365_s0  }
 0x39f   : > { %s1370_s5 = scalar_lea.sflag [#allocation5], %s2064_s20  ;;  %s1727_s16 = scalar_lea.vmem %s2088_s27, 256 }
 0x3a0   : > { %p1728_p1 = scmp.ne.s32.totalorder %s2088_s27, %s1727_s16  ;;  %s1798_s30 = smov [#allocation4]  }
 0x3a1   : > { %s1731_s1 = sshll.u32 %s1798_s30, 4  ;;  %s1732_s1 = int_to_ptr.vmem [resolvable:$false] %s1731_s1 }
 0x3a2   : > { %p1729_p2 = pnand %p1728_p1, %p1917_p5  ;;  %s1733_s17 = scalar_lea.vmem %s1732_s1, 512 }
 0x3a3   : > { %p1734_p4 = scmp.lt.s32.totalorder %s2088_s27, %s1732_s1  ;;  %p1735_p7 = scmp.lt.s32.totalorder %s1733_s17, %s1727_s16 }
 0x3a4   : > { %p1730_p3 = pneg %p1729_p2 }
 0x3a5   : > { %p1736_p8 = por %p1735_p7, %p1734_p4 }
 0x3a7   : > { %p1737_p9 = pnand %p1736_p8, %p1730_p3 }
 0x3a9   : > { %1740 = shalt.err (!%p1737_p9)
}
 0x3aa   : > { %s1741_s20 = scalar_lea.hbm %s2086_s2, 256  ;;  %s1745_s0 = scalar_lea.hbm %s2166_s15, 512 }
 0x3ab   : > { %p1742_p10 = scmp.ne.s32.totalorder %s2086_s2, %s1741_s20  ;;  %p1746_p13 = scmp.lt.u32.totalorder %s2086_s2, %s2166_s15 }
 0x3ac   : > { %p1747_p0 = scmp.lt.u32.totalorder %s1745_s0, %s1741_s20  ;;  %p1749_p2 = scmp.lt.u32.totalorder %s1741_s20, %s2086_s2 }
 0x3ad   : > { %p1743_p11 = pnand %p1742_p10, %p1917_p5 }
 0x3ae   : > { %p1748_p1 = por %p1747_p0, %p1746_p13 }
 0x3af   : > { %p1744_p12 = pneg %p1743_p11 }
 0x3b0   : > { %p1750_p3 = por %p1749_p2, %p1748_p1 }
 0x3b2   : > { %p1751_p4 = pnand %p1750_p3, %p1744_p12 }
 0x3b4   : > { %1754 = shalt.err (!%p1751_p4)
}
 0x3b5   : > { %1636 = dma.vmem_to_hbm [thread:$0]  (%p1917_p5), %s2088_s27, 256, %s2086_s2, %s1370_s5  }
 0x3b6 PF: > { %p1646_p7 = scmp.ge.s32.totalorder %s1793_s21, 2  ;;  %s1410_s26 = sand.u32 1, %s1781_s18  }
 0x3b7   : > { %s1411_s4 = scalar_lea.sflag [#allocation3], %s1410_s26 }
 0x3b8   : > { %p1640_p8 = pnand %p1646_p7, %p1921_p6 }
 0x3ba   : > { %1772 = dma.done.wait (!%p1640_p8), %s1411_s4, 256  }
 0x3bb   : > { %1774 = vsyncadd (!%p1640_p8), %s1411_s4, 4294967040  ;;  %s1420_s16 = scalar_lea.sflag [#allocation5], %s1410_s26 }
 0x3bc   : > { %1776 = dma.done.wait (!%p1640_p8), %s1420_s16, 256  }
 0x3bd   : > { %1778 = vsyncadd (!%p1640_p8), %s1420_s16, 4294967040  ;;  %s2184_s28 = sld [smem:[#allocation8_spill]]  ;;  %s2185_s20 = sld [smem:[#allocation9_spill]] }
 0x3be   : > { %p29_p5 = scmp.ge.s32.totalorder %s1904_s24, 4   ;;  %s2186_s18 = smov %s1785_s19 }
 0x3bf   : > { %s2188_s21 = smov %s1904_s24 }
 0x3c0   :  { %31 = sbr.rel (!%p29_p5) target bundleno = 12 (0xc), region = 131 }
 0x3c3   : > { %s2187_s19 = smov %s2184_s28 }
 0x3c7   :  { %1425 = vsyncpa [#allocation3], 1 }
 0x3c8   :  { %1427 = vsyncpa [#allocation3 + $0x1], 1 }
 0x3c9   :  { %1428 = vsyncpa [#allocation5], 1 }
 0x3ca   :  { %1430 = vsyncpa [#allocation5 + $0x1], 1 }

</bundles_post_ra>
